<compile_context>
chip_gen: v7x
topology: tpu7x:2x2x1
jax: 0.10.0
libtpu: 0.0.40
codegen_flags: <defaults>
</compile_context>

<pallas_src>
import jax
import jax.numpy as jnp
from jax.experimental import pallas as pl
from jax.experimental.pallas import tpu as pltpu


# --------------------------------------------------------------------------
# Pallas kernel
# --------------------------------------------------------------------------
def _residual_block_kernel(x_ref, m1_ref, b1_ref, m2_ref, b2_ref, alpha_ref,
                           out_ref, pad_ref):
    # x_ref   : (B, H, W*C)          VMEM  packed input rows (lane axis = W*C)
    # mK_ref  : (3, W*C, W*C)        VMEM  banded row-matmul weights (BN folded)
    # bK_ref  : (1, W*C)             VMEM  bias row (BN shift + conv bias), f32
    # alpha   : (1,)                 SMEM  PReLU slope (single parameter)
    # out_ref : (B, H, W*C)          VMEM  lane-dense output
    # pad_ref : (B*(H+2), W*C)       VMEM  scratch slab; halo rows stay zero
    B, H, WC = x_ref.shape
    Hp = H + 2
    M = B * Hp                               # rows in the padded slab
    mm_dtype = pad_ref.dtype                 # bf16 (fast) or f32 (reference)

    zero_row = jnp.zeros((1, WC), mm_dtype)
    x = x_ref[...].astype(jnp.float32)       # keep f32 copy for the residual
    xs = x.astype(mm_dtype)

    # ---- stage the whole batch chunk into one H-padded slab -----------------
    # Zero halo rows BETWEEN images so the shifted matmuls cannot bleed rows
    # across images.  B is a small compile-time constant -> static loop.
    for b in range(B):
        base = b * Hp
        pad_ref[base:base + 1, :] = zero_row                       # top halo
        pad_ref[base + 1:base + 1 + H, :] = xs[b]
        pad_ref[base + H + 1:base + H + 2, :] = zero_row           # bottom halo

    def conv_bn(m_ref, b_ref):
        # One 3x3 conv + folded BN over ALL images in the chunk as three dense
        # (B*(H+2)-2, WC) x (WC, WC) MXU matmuls; f32 accumulation.
        acc = jnp.dot(pad_ref[0:M - 2, :], m_ref[0],
                      preferred_element_type=jnp.float32)
        acc = acc + jnp.dot(pad_ref[1:M - 1, :], m_ref[1],
                            preferred_element_type=jnp.float32)
        acc = acc + jnp.dot(pad_ref[2:M, :], m_ref[2],
                            preferred_element_type=jnp.float32)
        return acc + b_ref[...]              # (M-2, WC) f32

    # ---- conv1 + BN1 + PReLU -------------------------------------------------
    h = conv_bn(m1_ref, b1_ref)
    a = alpha_ref[0]                         # scalar from SMEM
    h = jnp.where(h > 0, h, a * h)

    # Row r of h is the output belonging at pad row r+1, so one dense store
    # puts every valid row exactly where conv2 needs it; the junk rows (the
    # 2 per-image rows computed across image boundaries) land on halo rows,
    # which are re-zeroed right after.
    pad_ref[1:M - 1, :] = h.astype(mm_dtype)
    for b in range(B):
        base = b * Hp
        pad_ref[base:base + 1, :] = zero_row
        pad_ref[base + H + 1:base + H + 2, :] = zero_row

    # ---- conv2 + BN2 -----------------------------------------------------------
    h2 = conv_bn(m2_ref, b2_ref)

    # ---- residual add; lane-dense store ---------------------------------------
    for b in range(B):
        base = b * Hp
        out_ref[b] = (x[b] + h2[base:base + H, :]).astype(out_ref.dtype)


def _pick_batch_block(N, H, target_rows=256):
    """Largest divisor of N whose padded slab is <= ~target_rows rows.

    target_rows ~ the MXU M dimension we want per matmul (256 on v6e/v7x,
    128 is already enough on v5e)."""
    cap = max(1, target_rows // (H + 2))
    best = 1
    for d in range(1, min(N, cap) + 1):
        if N % d == 0:
            best = d
    return best


def residual_block_packed(xp, m1, b1, m2, b2, alpha, *, block_batch=None):
    """xp: (N, H, W*C) packed activations (f32). Returns same shape."""
    N, H, WC = xp.shape
    mm_dtype = m1.dtype
    if block_batch is None:
        block_batch = _pick_batch_block(N, H)
    assert N % block_batch == 0, "block_batch must divide the batch size"
    grid = (N // block_batch,)

    def w_spec(shape):
        # Grid-invariant constants: single-buffer them (free VMEM headroom;
        # they are only DMA'd once anyway).
        return pl.BlockSpec(shape, lambda n: (0,) * len(shape),
                            pipeline_mode=pl.Buffered(1))

    grid_spec = pltpu.PrefetchScalarGridSpec(
        num_scalar_prefetch=0,
        grid=grid,
        in_specs=[
            pl.BlockSpec((block_batch, H, WC), lambda n: (n, 0, 0)),  # x chunk
            w_spec((3, WC, WC)),                                      # M1
            w_spec((1, WC)),                                          # bias1
            w_spec((3, WC, WC)),                                      # M2
            w_spec((1, WC)),                                          # bias2
            pl.BlockSpec(memory_space=pltpu.MemorySpace.SMEM),        # alpha
        ],
        out_specs=pl.BlockSpec((block_batch, H, WC), lambda n: (n, 0, 0)),
        scratch_shapes=[pltpu.VMEM((block_batch * (H + 2), WC), mm_dtype)],
    )
    return pl.pallas_call(
        _residual_block_kernel,
        out_shape=jax.ShapeDtypeStruct((N, H, WC), xp.dtype),
        grid_spec=grid_spec,
        compiler_params=pltpu.CompilerParams(
            dimension_semantics=("parallel",),       # shard batch chunks on TCs
            vmem_limit_bytes=32 * 1024 * 1024),
    )(xp, m1, b1, m2, b2, alpha)


# --------------------------------------------------------------------------
# Plain-JAX glue: BN folding + banded row-matmul weight construction
# --------------------------------------------------------------------------
def fold_bn(conv_bias, gamma, beta, mean, var, eps=1e-5):
    """Fold eval-mode BatchNorm (+ preceding conv bias) into scale/shift."""
    scale = gamma / jnp.sqrt(var + eps)
    shift = beta + (conv_bias - mean) * scale
    return scale, shift


def build_row_weights(w_hwio, scale, shift, W, dtype=jnp.float32):
    """Fold a 3x3 HWIO conv (+BN scale/shift) into 3 banded (W*C, W*C)
    matrices (one per vertical tap dy) and a (1, W*C) f32 bias row.

    M[dy][xi*C+ci, xo*C+co] = w[dy, dx, ci, co] * scale[co]   with
    dx = xi - xo + 1 in {0,1,2} (edges truncated = implicit zero W-padding).
    Built once per call in plain JAX; pure layout/weight plumbing.
    """
    C = w_hwio.shape[2]
    ws = (w_hwio * scale[None, None, None, :]).astype(jnp.float32)
    mats = []
    for dy in range(3):
        m = jnp.zeros((W * C, W * C), jnp.float32)
        for dx in range(3):
            band = jnp.eye(W, k=1 - dx, dtype=jnp.float32)   # xi = xo + dx - 1
            m = m + jnp.kron(band, ws[dy, dx])
        mats.append(m)
    m3 = jnp.stack(mats).astype(dtype)                       # (3, W*C, W*C)
    bias = jnp.tile(shift.astype(jnp.float32), W).reshape(1, W * C)
    return m3, bias


def prepare_packed_params(params, W, matmul_dtype=jnp.bfloat16):
    (w1, b1, g1, be1, m1, v1, alpha, w2, b2, g2, be2, m2, v2) = params
    s1, t1 = fold_bn(b1, g1, be1, m1, v1)
    s2, t2 = fold_bn(b2, g2, be2, m2, v2)
    m1_row, bias1 = build_row_weights(w1, s1, t1, W, matmul_dtype)
    m2_row, bias2 = build_row_weights(w2, s2, t2, W, matmul_dtype)
    alpha_arr = jnp.asarray(alpha, jnp.float32).reshape(1)
    return m1_row, bias1, m2_row, bias2, alpha_arr


def residual_block_nhwc(x_nhwc, params, matmul_dtype=jnp.bfloat16):
    """Preferred entry point: NHWC in/out.  Packing NHWC -> (N, H, W*C) is a
    free reshape (no data movement), so no extra HBM passes per block."""
    N, H, W, C = x_nhwc.shape
    pp = prepare_packed_params(params, W, matmul_dtype)
    yp = residual_block_packed(x_nhwc.reshape(N, H, W * C), *pp)
    return yp.reshape(N, H, W, C)


def residual_block_nchw(x_nchw, params, matmul_dtype=jnp.bfloat16):
    """PyTorch-parity entry point (NCHW in/out).  The two transposes here are
    a full extra HBM pass each; real pipelines should use the NHWC / packed
    entry points and keep activations packed across residual blocks."""
    N, C, H, W = x_nchw.shape
    x_nhwc = jnp.transpose(x_nchw, (0, 2, 3, 1))
    y_nhwc = residual_block_nhwc(x_nhwc, params, matmul_dtype)
    return jnp.transpose(y_nhwc, (0, 3, 1, 2))


# --------------------------------------------------------------------------
# Pure-JAX reference (un-folded BN) for correctness checking
# --------------------------------------------------------------------------
def ref_forward_nchw(x_nchw, params, eps=1e-5):
    (w1, b1, g1, be1, m1, v1, alpha, w2, b2, g2, be2, m2, v2) = params
    x = jnp.transpose(x_nchw, (0, 2, 3, 1))

    def conv(h, w, b):
        y = jax.lax.conv_general_dilated(
            h, w, window_strides=(1, 1), padding="SAME",
            dimension_numbers=("NHWC", "HWIO", "NHWC"))
        return y + b

    def bn(y, g, be, m, v):
        return g * (y - m) / jnp.sqrt(v + eps) + be

    h = bn(conv(x, w1, b1), g1, be1, m1, v1)
    h = jnp.where(h > 0, h, alpha * h)
    h = bn(conv(h, w2, b2), g2, be2, m2, v2)
    return jnp.transpose(x + h, (0, 3, 1, 2))


def init_params(key, in_features):
    """Deterministic synthetic parameters (shapes match the PyTorch module)."""
    C = in_features
    ks = jax.random.split(key, 12)

    def rnd(k, shape, scale=0.1):
        return scale * jax.random.normal(k, shape, jnp.float32)

    # Conv weights are stored HWIO (PyTorch would be OIHW).
    w1 = rnd(ks[0], (3, 3, C, C)); b1 = rnd(ks[1], (C,))
    g1 = 1.0 + rnd(ks[2], (C,));   be1 = rnd(ks[3], (C,))
    m1 = rnd(ks[4], (C,));         v1 = jnp.abs(rnd(ks[5], (C,), 1.0)) + 0.5
    w2 = rnd(ks[6], (3, 3, C, C)); b2 = rnd(ks[7], (C,))
    g2 = 1.0 + rnd(ks[8], (C,));   be2 = rnd(ks[9], (C,))
    m2 = rnd(ks[10], (C,));        v2 = jnp.abs(rnd(ks[11], (C,), 1.0)) + 0.5
    alpha = jnp.float32(0.25)      # nn.PReLU() default (single parameter)
    return (w1, b1, g1, be1, m1, v1, alpha, w2, b2, g2, be2, m2, v2)


if __name__ == "__main__":
    key = jax.random.PRNGKey(0)
    k_x, k_p = jax.random.split(key)

    N, C, H, W = 2, 8, 16, 16           # in_features = 8; W*C = 128 lane-dense
    x = jax.random.normal(k_x, (N, C, H, W), jnp.float32)   # NCHW like PyTorch
    params = init_params(k_p, C)

    ref = ref_forward_nchw(x, params)

    # Fast path: bf16 MXU operands (v6e/v7x), f32 accumulation + f32 VPU math.
    fwd_bf16 = jax.jit(lambda xx, pp: residual_block_nchw(xx, pp, jnp.bfloat16))
    out_bf16 = jax.block_until_ready(fwd_bf16(x, params))
    assert out_bf16.shape == (N, C, H, W)
    err_bf16 = float(jnp.max(jnp.abs(out_bf16 - ref)))
    assert err_bf16 < 7.5e-2, f"bf16 path max_err={err_bf16}"

    # Reference/debug path: pure f32 operands (exact parity with the module).
    fwd_f32 = jax.jit(lambda xx, pp: residual_block_nchw(xx, pp, jnp.float32))
    out_f32 = jax.block_until_ready(fwd_f32(x, params))
    err_f32 = float(jnp.max(jnp.abs(out_f32 - ref)))
    assert err_f32 < 1e-4, f"f32 path max_err={err_f32}"

    print("KERNEL_OK")
</pallas_src>

<mosaic_0001>
module attributes {stable_mosaic.version = 11 : i64} {
  func.func @_residual_block_kernel(%arg0: i32, %arg1: memref<2x16x128xf32, #tpu.memory_space<vmem>>, %arg2: memref<3x128x128xbf16, #tpu.memory_space<vmem>>, %arg3: memref<1x128xf32, #tpu.memory_space<vmem>>, %arg4: memref<3x128x128xbf16, #tpu.memory_space<vmem>>, %arg5: memref<1x128xf32, #tpu.memory_space<vmem>>, %arg6: memref<1xf32, #tpu.memory_space<smem>>, %arg7: memref<2x16x128xf32, #tpu.memory_space<vmem>>, %arg8: memref<36x128xbf16, #tpu.memory_space<vmem>>) attributes {dimension_semantics = [#tpu.dimension_semantics<parallel>], iteration_bounds = array<i64: 1>, scalar_prefetch = 0 : i64, scratch_operands = 1 : i64, tpu.core_type = #tpu.core_type<tc>, window_params = [{transform_indices = @transform_0, window_bounds = array<i64: 2, 16, 128>}, {pipeline_mode = #tpu.pipeline_mode<synchronous>, transform_indices = @transform_1, window_bounds = array<i64: 3, 128, 128>}, {pipeline_mode = #tpu.pipeline_mode<synchronous>, transform_indices = @transform_2, window_bounds = array<i64: 1, 128>}, {pipeline_mode = #tpu.pipeline_mode<synchronous>, transform_indices = @transform_3, window_bounds = array<i64: 3, 128, 128>}, {pipeline_mode = #tpu.pipeline_mode<synchronous>, transform_indices = @transform_4, window_bounds = array<i64: 1, 128>}, {transform_indices = @transform_5, window_bounds = array<i64: 1>}, {transform_indices = @transform_6, window_bounds = array<i64: 2, 16, 128>}]} {
    %cst = arith.constant 0.000000e+00 : bf16
    %0 = vector.broadcast %cst : bf16 to vector<1x128xbf16>
    %c0 = arith.constant 0 : index
    %c0_0 = arith.constant 0 : index
    %c0_1 = arith.constant 0 : index
    %1 = vector.load %arg1[%c0, %c0_0, %c0_1] : memref<2x16x128xf32, #tpu.memory_space<vmem>>, vector<2x16x128xf32>
    %2 = arith.truncf %1 : vector<2x16x128xf32> to vector<2x16x128xbf16>
    %c0_2 = arith.constant 0 : index
    %c0_3 = arith.constant 0 : index
    %3 = vector.load %arg8[%c0_2, %c0_3] : memref<36x128xbf16, #tpu.memory_space<vmem>>, vector<1x128xbf16>
    tpu.vector_store %arg8[%c0_2, %c0_3], %0 {strides = array<i32>} : memref<36x128xbf16, #tpu.memory_space<vmem>>, vector<1x128xbf16>,
    %4 = vector.extract_strided_slice %2 {offsets = [0, 0, 0], sizes = [1, 16, 128], strides = [1, 1, 1]} : vector<2x16x128xbf16> to vector<1x16x128xbf16>
    %5 = vector.shape_cast %4 : vector<1x16x128xbf16> to vector<16x128xbf16>
    %c1 = arith.constant 1 : index
    %c0_4 = arith.constant 0 : index
    %6 = vector.load %arg8[%c1, %c0_4] : memref<36x128xbf16, #tpu.memory_space<vmem>>, vector<16x128xbf16>
    tpu.vector_store %arg8[%c1, %c0_4], %5 {strides = array<i32>} : memref<36x128xbf16, #tpu.memory_space<vmem>>, vector<16x128xbf16>,
    %c17 = arith.constant 17 : index
    %c0_5 = arith.constant 0 : index
    %7 = vector.load %arg8[%c17, %c0_5] : memref<36x128xbf16, #tpu.memory_space<vmem>>, vector<1x128xbf16>
    tpu.vector_store %arg8[%c17, %c0_5], %0 {strides = array<i32>} : memref<36x128xbf16, #tpu.memory_space<vmem>>, vector<1x128xbf16>,
    %c18 = arith.constant 18 : index
    %c0_6 = arith.constant 0 : index
    %8 = vector.load %arg8[%c18, %c0_6] : memref<36x128xbf16, #tpu.memory_space<vmem>>, vector<1x128xbf16>
    tpu.vector_store %arg8[%c18, %c0_6], %0 {strides = array<i32>} : memref<36x128xbf16, #tpu.memory_space<vmem>>, vector<1x128xbf16>,
    %9 = vector.extract_strided_slice %2 {offsets = [1, 0, 0], sizes = [1, 16, 128], strides = [1, 1, 1]} : vector<2x16x128xbf16> to vector<1x16x128xbf16>
    %10 = vector.shape_cast %9 : vector<1x16x128xbf16> to vector<16x128xbf16>
    %c19 = arith.constant 19 : index
    %c0_7 = arith.constant 0 : index
    %11 = vector.load %arg8[%c19, %c0_7] : memref<36x128xbf16, #tpu.memory_space<vmem>>, vector<16x128xbf16>
    tpu.vector_store %arg8[%c19, %c0_7], %10 {strides = array<i32>} : memref<36x128xbf16, #tpu.memory_space<vmem>>, vector<16x128xbf16>,
    %c35 = arith.constant 35 : index
    %c0_8 = arith.constant 0 : index
    %12 = vector.load %arg8[%c35, %c0_8] : memref<36x128xbf16, #tpu.memory_space<vmem>>, vector<1x128xbf16>
    tpu.vector_store %arg8[%c35, %c0_8], %0 {strides = array<i32>} : memref<36x128xbf16, #tpu.memory_space<vmem>>, vector<1x128xbf16>,
    %c0_9 = arith.constant 0 : index
    %c0_10 = arith.constant 0 : index
    %13 = vector.load %arg8[%c0_9, %c0_10] : memref<36x128xbf16, #tpu.memory_space<vmem>>, vector<34x128xbf16>
    %c0_11 = arith.constant 0 : index
    %c0_12 = arith.constant 0 : index
    %c0_13 = arith.constant 0 : index
    %14 = vector.load %arg2[%c0_11, %c0_12, %c0_13] : memref<3x128x128xbf16, #tpu.memory_space<vmem>>, vector<1x128x128xbf16>
    %15 = vector.shape_cast %14 : vector<1x128x128xbf16> to vector<128x128xbf16>
    %cst_14 = arith.constant dense<0.000000e+00> : vector<34x128xf32>
    %16 = tpu.matmul %13, %15, %cst_14 {dimension_numbers = #tpu.dot_dimension_numbers<[1], [0], [0], [1], [0, 0, 1, 1], [], []>} : vector<34x128xbf16>, vector<128x128xbf16>, vector<34x128xf32> -> vector<34x128xf32>
    %c1_15 = arith.constant 1 : index
    %c0_16 = arith.constant 0 : index
    %17 = vector.load %arg8[%c1_15, %c0_16] : memref<36x128xbf16, #tpu.memory_space<vmem>>, vector<34x128xbf16>
    %c1_17 = arith.constant 1 : index
    %c0_18 = arith.constant 0 : index
    %c0_19 = arith.constant 0 : index
    %18 = vector.load %arg2[%c1_17, %c0_18, %c0_19] : memref<3x128x128xbf16, #tpu.memory_space<vmem>>, vector<1x128x128xbf16>
    %19 = vector.shape_cast %18 : vector<1x128x128xbf16> to vector<128x128xbf16>
    %cst_20 = arith.constant dense<0.000000e+00> : vector<34x128xf32>
    %20 = tpu.matmul %17, %19, %cst_20 {dimension_numbers = #tpu.dot_dimension_numbers<[1], [0], [0], [1], [0, 0, 1, 1], [], []>} : vector<34x128xbf16>, vector<128x128xbf16>, vector<34x128xf32> -> vector<34x128xf32>
    %21 = arith.addf %16, %20 : vector<34x128xf32>
    %c2 = arith.constant 2 : index
    %c0_21 = arith.constant 0 : index
    %22 = vector.load %arg8[%c2, %c0_21] : memref<36x128xbf16, #tpu.memory_space<vmem>>, vector<34x128xbf16>
    %c2_22 = arith.constant 2 : index
    %c0_23 = arith.constant 0 : index
    %c0_24 = arith.constant 0 : index
    %23 = vector.load %arg2[%c2_22, %c0_23, %c0_24] : memref<3x128x128xbf16, #tpu.memory_space<vmem>>, vector<1x128x128xbf16>
    %24 = vector.shape_cast %23 : vector<1x128x128xbf16> to vector<128x128xbf16>
    %cst_25 = arith.constant dense<0.000000e+00> : vector<34x128xf32>
    %25 = tpu.matmul %22, %24, %cst_25 {dimension_numbers = #tpu.dot_dimension_numbers<[1], [0], [0], [1], [0, 0, 1, 1], [], []>} : vector<34x128xbf16>, vector<128x128xbf16>, vector<34x128xf32> -> vector<34x128xf32>
    %26 = arith.addf %21, %25 : vector<34x128xf32>
    %c0_26 = arith.constant 0 : index
    %c0_27 = arith.constant 0 : index
    %27 = vector.load %arg3[%c0_26, %c0_27] : memref<1x128xf32, #tpu.memory_space<vmem>>, vector<1x128xf32>
    %28 = vector.broadcast %27 : vector<1x128xf32> to vector<34x128xf32>
    %29 = arith.addf %26, %28 : vector<34x128xf32>
    %c0_28 = arith.constant 0 : index
    %30 = memref.load %arg6[%c0_28] : memref<1xf32, #tpu.memory_space<smem>>
    %cst_29 = arith.constant 0.000000e+00 : f32
    %31 = vector.broadcast %cst_29 : f32 to vector<34x128xf32>
    %32 = arith.cmpf ogt, %29, %31 : vector<34x128xf32>
    %33 = vector.broadcast %30 : f32 to vector<34x128xf32>
    %34 = arith.mulf %33, %29 : vector<34x128xf32>
    %35 = arith.select %32, %29, %34 : vector<34x128xi1>, vector<34x128xf32>
    %36 = arith.truncf %35 : vector<34x128xf32> to vector<34x128xbf16>
    %c1_30 = arith.constant 1 : index
    %c0_31 = arith.constant 0 : index
    %37 = vector.load %arg8[%c1_30, %c0_31] : memref<36x128xbf16, #tpu.memory_space<vmem>>, vector<34x128xbf16>
    tpu.vector_store %arg8[%c1_30, %c0_31], %36 {strides = array<i32>} : memref<36x128xbf16, #tpu.memory_space<vmem>>, vector<34x128xbf16>,
    %c0_32 = arith.constant 0 : index
    %c0_33 = arith.constant 0 : index
    %38 = vector.load %arg8[%c0_32, %c0_33] : memref<36x128xbf16, #tpu.memory_space<vmem>>, vector<1x128xbf16>
    tpu.vector_store %arg8[%c0_32, %c0_33], %0 {strides = array<i32>} : memref<36x128xbf16, #tpu.memory_space<vmem>>, vector<1x128xbf16>,
    %c17_34 = arith.constant 17 : index
    %c0_35 = arith.constant 0 : index
    %39 = vector.load %arg8[%c17_34, %c0_35] : memref<36x128xbf16, #tpu.memory_space<vmem>>, vector<1x128xbf16>
    tpu.vector_store %arg8[%c17_34, %c0_35], %0 {strides = array<i32>} : memref<36x128xbf16, #tpu.memory_space<vmem>>, vector<1x128xbf16>,
    %c18_36 = arith.constant 18 : index
    %c0_37 = arith.constant 0 : index
    %40 = vector.load %arg8[%c18_36, %c0_37] : memref<36x128xbf16, #tpu.memory_space<vmem>>, vector<1x128xbf16>
    tpu.vector_store %arg8[%c18_36, %c0_37], %0 {strides = array<i32>} : memref<36x128xbf16, #tpu.memory_space<vmem>>, vector<1x128xbf16>,
    %c35_38 = arith.constant 35 : index
    %c0_39 = arith.constant 0 : index
    %41 = vector.load %arg8[%c35_38, %c0_39] : memref<36x128xbf16, #tpu.memory_space<vmem>>, vector<1x128xbf16>
    tpu.vector_store %arg8[%c35_38, %c0_39], %0 {strides = array<i32>} : memref<36x128xbf16, #tpu.memory_space<vmem>>, vector<1x128xbf16>,
    %c0_40 = arith.constant 0 : index
    %c0_41 = arith.constant 0 : index
    %42 = vector.load %arg8[%c0_40, %c0_41] : memref<36x128xbf16, #tpu.memory_space<vmem>>, vector<34x128xbf16>
    %c0_42 = arith.constant 0 : index
    %c0_43 = arith.constant 0 : index
    %c0_44 = arith.constant 0 : index
    %43 = vector.load %arg4[%c0_42, %c0_43, %c0_44] : memref<3x128x128xbf16, #tpu.memory_space<vmem>>, vector<1x128x128xbf16>
    %44 = vector.shape_cast %43 : vector<1x128x128xbf16> to vector<128x128xbf16>
    %cst_45 = arith.constant dense<0.000000e+00> : vector<34x128xf32>
    %45 = tpu.matmul %42, %44, %cst_45 {dimension_numbers = #tpu.dot_dimension_numbers<[1], [0], [0], [1], [0, 0, 1, 1], [], []>} : vector<34x128xbf16>, vector<128x128xbf16>, vector<34x128xf32> -> vector<34x128xf32>
    %c1_46 = arith.constant 1 : index
    %c0_47 = arith.constant 0 : index
    %46 = vector.load %arg8[%c1_46, %c0_47] : memref<36x128xbf16, #tpu.memory_space<vmem>>, vector<34x128xbf16>
    %c1_48 = arith.constant 1 : index
    %c0_49 = arith.constant 0 : index
    %c0_50 = arith.constant 0 : index
    %47 = vector.load %arg4[%c1_48, %c0_49, %c0_50] : memref<3x128x128xbf16, #tpu.memory_space<vmem>>, vector<1x128x128xbf16>
    %48 = vector.shape_cast %47 : vector<1x128x128xbf16> to vector<128x128xbf16>
    %cst_51 = arith.constant dense<0.000000e+00> : vector<34x128xf32>
    %49 = tpu.matmul %46, %48, %cst_51 {dimension_numbers = #tpu.dot_dimension_numbers<[1], [0], [0], [1], [0, 0, 1, 1], [], []>} : vector<34x128xbf16>, vector<128x128xbf16>, vector<34x128xf32> -> vector<34x128xf32>
    %50 = arith.addf %45, %49 : vector<34x128xf32>
    %c2_52 = arith.constant 2 : index
    %c0_53 = arith.constant 0 : index
    %51 = vector.load %arg8[%c2_52, %c0_53] : memref<36x128xbf16, #tpu.memory_space<vmem>>, vector<34x128xbf16>
    %c2_54 = arith.constant 2 : index
    %c0_55 = arith.constant 0 : index
    %c0_56 = arith.constant 0 : index
    %52 = vector.load %arg4[%c2_54, %c0_55, %c0_56] : memref<3x128x128xbf16, #tpu.memory_space<vmem>>, vector<1x128x128xbf16>
    %53 = vector.shape_cast %52 : vector<1x128x128xbf16> to vector<128x128xbf16>
    %cst_57 = arith.constant dense<0.000000e+00> : vector<34x128xf32>
    %54 = tpu.matmul %51, %53, %cst_57 {dimension_numbers = #tpu.dot_dimension_numbers<[1], [0], [0], [1], [0, 0, 1, 1], [], []>} : vector<34x128xbf16>, vector<128x128xbf16>, vector<34x128xf32> -> vector<34x128xf32>
    %55 = arith.addf %50, %54 : vector<34x128xf32>
    %c0_58 = arith.constant 0 : index
    %c0_59 = arith.constant 0 : index
    %56 = vector.load %arg5[%c0_58, %c0_59] : memref<1x128xf32, #tpu.memory_space<vmem>>, vector<1x128xf32>
    %57 = vector.broadcast %56 : vector<1x128xf32> to vector<34x128xf32>
    %58 = arith.addf %55, %57 : vector<34x128xf32>
    %59 = vector.extract_strided_slice %1 {offsets = [0, 0, 0], sizes = [1, 16, 128], strides = [1, 1, 1]} : vector<2x16x128xf32> to vector<1x16x128xf32>
    %60 = vector.shape_cast %59 : vector<1x16x128xf32> to vector<16x128xf32>
    %61 = vector.extract_strided_slice %58 {offsets = [0, 0], sizes = [16, 128], strides = [1, 1]} : vector<34x128xf32> to vector<16x128xf32>
    %62 = arith.addf %60, %61 : vector<16x128xf32>
    %c0_60 = arith.constant 0 : index
    %c0_61 = arith.constant 0 : index
    %c0_62 = arith.constant 0 : index
    %63 = vector.load %arg7[%c0_60, %c0_61, %c0_62] : memref<2x16x128xf32, #tpu.memory_space<vmem>>, vector<1x16x128xf32>
    %64 = vector.shape_cast %63 : vector<1x16x128xf32> to vector<16x128xf32>
    %65 = vector.shape_cast %62 : vector<16x128xf32> to vector<1x16x128xf32>
    tpu.vector_store %arg7[%c0_60, %c0_61, %c0_62], %65 {strides = array<i32>} : memref<2x16x128xf32, #tpu.memory_space<vmem>>, vector<1x16x128xf32>,
    %66 = vector.extract_strided_slice %1 {offsets = [1, 0, 0], sizes = [1, 16, 128], strides = [1, 1, 1]} : vector<2x16x128xf32> to vector<1x16x128xf32>
    %67 = vector.shape_cast %66 : vector<1x16x128xf32> to vector<16x128xf32>
    %68 = vector.extract_strided_slice %58 {offsets = [18, 0], sizes = [16, 128], strides = [1, 1]} : vector<34x128xf32> to vector<16x128xf32>
    %69 = arith.addf %67, %68 : vector<16x128xf32>
    %c1_63 = arith.constant 1 : index
    %c0_64 = arith.constant 0 : index
    %c0_65 = arith.constant 0 : index
    %70 = vector.load %arg7[%c1_63, %c0_64, %c0_65] : memref<2x16x128xf32, #tpu.memory_space<vmem>>, vector<1x16x128xf32>
    %71 = vector.shape_cast %70 : vector<1x16x128xf32> to vector<16x128xf32>
    %72 = vector.shape_cast %69 : vector<16x128xf32> to vector<1x16x128xf32>
    tpu.vector_store %arg7[%c1_63, %c0_64, %c0_65], %72 {strides = array<i32>} : memref<2x16x128xf32, #tpu.memory_space<vmem>>, vector<1x16x128xf32>,
    return
  }
  func.func @transform_0(%arg0: i32) -> (i32, i32, i32) {
    %c0_i32 = arith.constant 0 : i32
    %c0_i32_0 = arith.constant 0 : i32
    %c0_i32_1 = arith.constant 0 : i32
    return %arg0, %c0_i32, %c0_i32_0 : i32, i32, i32
  }
  func.func @transform_1(%arg0: i32) -> (i32, i32, i32) {
    %c0_i32 = arith.constant 0 : i32
    %c0_i32_0 = arith.constant 0 : i32
    %c0_i32_1 = arith.constant 0 : i32
    %c0_i32_2 = arith.constant 0 : i32
    return %c0_i32, %c0_i32_0, %c0_i32_1 : i32, i32, i32
  }
  func.func @transform_2(%arg0: i32) -> (i32, i32) {
    %c0_i32 = arith.constant 0 : i32
    %c0_i32_0 = arith.constant 0 : i32
    %c0_i32_1 = arith.constant 0 : i32
    return %c0_i32, %c0_i32_0 : i32, i32
  }
  func.func @transform_3(%arg0: i32) -> (i32, i32, i32) {
    %c0_i32 = arith.constant 0 : i32
    %c0_i32_0 = arith.constant 0 : i32
    %c0_i32_1 = arith.constant 0 : i32
    %c0_i32_2 = arith.constant 0 : i32
    return %c0_i32, %c0_i32_0, %c0_i32_1 : i32, i32, i32
  }
  func.func @transform_4(%arg0: i32) -> (i32, i32) {
    %c0_i32 = arith.constant 0 : i32
    %c0_i32_0 = arith.constant 0 : i32
    %c0_i32_1 = arith.constant 0 : i32
    return %c0_i32, %c0_i32_0 : i32, i32
  }
  func.func @transform_5(%arg0: i32) -> i32 {
    %c0_i32 = arith.constant 0 : i32
    %c0_i32_0 = arith.constant 0 : i32
    return %c0_i32 : i32
  }
  func.func @transform_6(%arg0: i32) -> (i32, i32, i32) {
    %c0_i32 = arith.constant 0 : i32
    %c0_i32_0 = arith.constant 0 : i32
    %c0_i32_1 = arith.constant 0 : i32
    return %arg0, %c0_i32, %c0_i32_0 : i32, i32, i32
  }
}

</mosaic_0001>

<bundles_post_ra>
// kernel: tile.13
= control target key start
LH: loop header
LB: loop body
LE: loop exit
PB: predicated region body
PF: predicated region fallthrough
CT: control target
= control target key end

     0   :  { %s28_s0 = inlined_call_operand.vmem [shape: f32[8], index: 0, kind: input, shape index: {}]   ;;  %s29_s1 = inlined_call_operand.vmem [shape: f32[16,8], index: 1, kind: output, shape index: {}]  }
   0x1   :  { %v4_v0 = vld [vmem:[%s28_s0] ss:$0 sm:$0xff] }
   0x2   :  { %5 = vst [vmem:[%s29_s1] sm:$0xff] %v4_v0  ;;  %8 = vst [vmem:[%s29_s1 + $0x8] sm:$0xff] %v4_v0 }

// kernel: tile.14
= control target key start
LH: loop header
LB: loop body
LE: loop exit
PB: predicated region body
PF: predicated region fallthrough
CT: control target
= control target key end

     0   :  { %s131_s10 = smov 120   ;;  %s132_s11 = smov 104   ;;  %vm3_vm0 = vcmask 64512   ;;  %vm9_vm1 = vcmask 1048512   ;;  %vm15_vm2 = vcmask 982912   ;;  %vm21_vm3 = vcmask 917312   ;;  %s207_s0 = inlined_call_operand.vmem [shape: f32[16,8], index: 0, kind: input, shape index: {}]   ;;  %s208_s1 = inlined_call_operand.vmem [shape: f32[1,128], index: 1, kind: output, shape index: {}]  }
   0x1   :  { %v101_v0 = vld [vmem:[%s207_s0 + $0xf] sm:$0x1]   ;;  %v103_v1 = vld [vmem:[%s207_s0 + $0xd] sm:$0x1]   ;;  %v102_v2 = vld [vmem:[%s207_s0 + $0xe] sm:$0x1]  }
   0x2   :  { %7 = vrot.lane.b32.xlu0 %v101_v0, %s131_s10  ;;  %19 = vrot.lane.b32.xlu1 %v103_v1, %s132_s11  ;;  %v104_v3 = vld [vmem:[%s207_s0 + $0xc] sm:$0x1]   ;;  %s133_s16 = smov 112   ;;  %s134_s17 = smov 96   ;;  %v105_v4 = vld [vmem:[%s207_s0 + $0xb] sm:$0x1]  }
   0x3   :  { %v106_v5 = vld [vmem:[%s207_s0 + $0xa] sm:$0x1]   ;;  %v2_v6 = vld [vmem:[%s207_s0] sm:$0x1]   ;;  %s135_s24 = smov 88   ;;  %s136_s25 = smov 80  }
   0x4   :  { %4 = vst.msk [vmem:[#allocation0] sm:$0x1] %vm3_vm0, %v2_v6   ;;  %v107_v7 = vld [vmem:[%s207_s0 + $0x9] sm:$0x1]   ;;  %v108_v8 = vld [vmem:[%s207_s0 + $0x8] sm:$0x1]  }
   0x5   :  { %s137_s30 = smov 72   ;;  %s138_s2 = smov 64   ;;  %v109_v9 = vld [vmem:[%s207_s0 + $0x7] sm:$0x1]   ;;  %v110_v10 = vld [vmem:[%s207_s0 + $0x6] sm:$0x1]  }
   0x6   :  { %13 = vrot.lane.b32.xlu0 %v102_v2, %s133_s16  ;;  %25 = vrot.lane.b32.xlu1 %v104_v3, %s134_s17  ;;  %s139_s7 = smov 56   ;;  %s140_s8 = smov 48   ;;  %v111_v11 = vld [vmem:[%s207_s0 + $0x5] sm:$0x1]   ;;  %v112_v12 = vld [vmem:[%s207_s0 + $0x4] sm:$0x1]  }
   0x7   :  { %s141_s13 = smov 40   ;;  %s142_s14 = smov 32   ;;  %v113_v13 = vld [vmem:[%s207_s0 + $0x3] sm:$0x1]   ;;  %v114_v14 = vld [vmem:[%s207_s0 + $0x2] sm:$0x1]  }
   0x8   :  { %s143_s19 = smov 24   ;;  %s144_s20 = smov 16   ;;  %v115_v15 = vld [vmem:[%s207_s0 + $0x1] sm:$0x1]   ;;  %vm27_vm4 = vcmask 851712   ;;  %vm33_vm5 = vcmask 786112  }
   0x9   :  { %s145_s0 = smov 8   ;;  %vm39_vm6 = vcmask 720512   ;;  %vm45_vm7 = vcmask 654912   ;;  %vm51_vm8 = vcmask 589312   ;;  %vm57_vm9 = vcmask 523712  }
   0xa   :  { %31 = vrot.lane.b32.xlu0 %v105_v4, %s135_s24  ;;  %37 = vrot.lane.b32.xlu1 %v106_v5, %s136_s25  ;;  %vm63_vm10 = vcmask 458112   ;;  %vm69_vm11 = vcmask 392512   ;;  %vm75_vm12 = vcmask 326912   ;;  %vm81_vm13 = vcmask 261312  }
   0xb   :  { %vm87_vm14 = vcmask 195712   ;;  %vm93_vm15 = vcmask 130112  }
   0xe   :  { %43 = vrot.lane.b32.xlu0 %v107_v7, %s137_s30  ;;  %49 = vrot.lane.b32.xlu1 %v108_v8, %s138_s2 }
  0x12   :  { %55 = vrot.lane.b32.xlu0 %v109_v9, %s139_s7  ;;  %61 = vrot.lane.b32.xlu1 %v110_v10, %s140_s8 }
  0x16   :  { %67 = vrot.lane.b32.xlu0 %v111_v11, %s141_s13  ;;  %73 = vrot.lane.b32.xlu1 %v112_v12, %s142_s14 }
  0x1a   :  { %79 = vrot.lane.b32.xlu0 %v113_v13, %s143_s19  ;;  %85 = vrot.lane.b32.xlu1 %v114_v14, %s144_s20 }
  0x1e   :  { %91 = vrot.lane.b32.xlu0 %v115_v15, %s145_s0 }
  0x74   :  { %v8_v16 = vpop.permute.xlu0 %7   ;;  %v20_v17 = vpop.permute.xlu1 %19  }
  0x75   :  { %10 = vst.msk [vmem:[#allocation0] sm:$0x1] %vm9_vm1, %v8_v16  }
  0x78   :  { %v14_v18 = vpop.permute.xlu0 %13   ;;  %v26_v19 = vpop.permute.xlu1 %25  }
  0x79   :  { %16 = vst.msk [vmem:[#allocation0] sm:$0x1] %vm15_vm2, %v14_v18  }
  0x7a   :  { %22 = vst.msk [vmem:[#allocation0] sm:$0x1] %vm21_vm3, %v20_v17  }
  0x7b   :  { %28 = vst.msk [vmem:[#allocation0] sm:$0x1] %vm27_vm4, %v26_v19  }
  0x7c   :  { %v32_v20 = vpop.permute.xlu0 %31   ;;  %v38_v21 = vpop.permute.xlu1 %37  }
  0x7d   :  { %34 = vst.msk [vmem:[#allocation0] sm:$0x1] %vm33_vm5, %v32_v20  }
  0x7e   :  { %40 = vst.msk [vmem:[#allocation0] sm:$0x1] %vm39_vm6, %v38_v21  }
  0x80   :  { %v44_v22 = vpop.permute.xlu0 %43   ;;  %v50_v23 = vpop.permute.xlu1 %49  }
  0x81   :  { %46 = vst.msk [vmem:[#allocation0] sm:$0x1] %vm45_vm7, %v44_v22  }
  0x82   :  { %52 = vst.msk [vmem:[#allocation0] sm:$0x1] %vm51_vm8, %v50_v23  }
  0x84   :  { %v56_v24 = vpop.permute.xlu0 %55   ;;  %v62_v25 = vpop.permute.xlu1 %61  }
  0x85   :  { %58 = vst.msk [vmem:[#allocation0] sm:$0x1] %vm57_vm9, %v56_v24  }
  0x86   :  { %64 = vst.msk [vmem:[#allocation0] sm:$0x1] %vm63_vm10, %v62_v25  }
  0x88   :  { %v68_v26 = vpop.permute.xlu0 %67   ;;  %v74_v27 = vpop.permute.xlu1 %73  }
  0x89   :  { %70 = vst.msk [vmem:[#allocation0] sm:$0x1] %vm69_vm11, %v68_v26  }
  0x8a   :  { %76 = vst.msk [vmem:[#allocation0] sm:$0x1] %vm75_vm12, %v74_v27  }
  0x8c   :  { %v80_v28 = vpop.permute.xlu0 %79   ;;  %v86_v29 = vpop.permute.xlu1 %85  }
  0x8d   :  { %82 = vst.msk [vmem:[#allocation0] sm:$0x1] %vm81_vm13, %v80_v28  }
  0x8e   :  { %88 = vst.msk [vmem:[#allocation0] sm:$0x1] %vm87_vm14, %v86_v29  }
  0x90   :  { %v92_v30 = vpop.permute.xlu0 %91  }
  0x91   :  { %94 = vst.msk [vmem:[#allocation0] sm:$0x1] %vm93_vm15, %v92_v30  }
  0x98   :  { %v98_v31 = vld [vmem:[#allocation0] sm:$0x1] }
  0x99   :  { %100 = vst [vmem:[%s208_s1] sm:$0x1] %v98_v31 }

// kernel: _lambda_.1
= control target key start
LH: loop header
LB: loop body
LE: loop exit
PB: predicated region body
PF: predicated region fallthrough
CT: control target
= control target key end

     0   :  { %v1582_v0 = vmov 0.0   ;;  %vm1583_vm0 = vmmov 0   ;;  %vm32_vm1 = vsmask.f32 256  ;;  %vm31_vm2 = vcmask 1040384   ;;  %s1996_s1 = inlined_call_operand.vmem [shape: bf16[3,128,128], index: 1, kind: input, shape index: {}]   ;;  %s1997_s0 = inlined_call_operand.vmem [shape: f32[2,16,128], index: 0, kind: input, shape index: {}]   ;;  %s1998_s3 = inlined_call_operand.vmem [shape: bf16[3,128,128], index: 3, kind: input, shape index: {}]   ;;  %s1999_s2 = inlined_call_operand.vmem [shape: f32[1,128], index: 2, kind: input, shape index: {}]   ;;  %s2000_s5 = inlined_call_operand.<no memory space> [shape: f32[1], index: 5, kind: input, shape index: {}]   ;;  %s2001_s4 = inlined_call_operand.vmem [shape: f32[1,128], index: 4, kind: input, shape index: {}]   ;;  %s2002_s6 = inlined_call_operand.vmem [shape: f32[2,16,128], index: 6, kind: output, shape index: {}]  }
   0x1   :  { %1350 = vmatprep.subr.bf16.mxu0 %v1582_v0  ;;  %1378 = vmatprep.subr.bf16.mxu1 %v1582_v0  ;;  %v1520_v1 = vld [vmem:[%s1996_s1 + $0x40] sm:$0xff]   ;;  %v1522_v3 = vld [vmem:[%s1996_s1 + $0x48] sm:$0xff]   ;;  %v1524_v5 = vld [vmem:[%s1996_s1 + $0x50] sm:$0xff]   ;;  %vm64_vm3 = vcmask 1043456   ;;  %vm78_vm4 = vcmask 1041409   ;;  %vm120_vm5 = vcmask 1041408  }
   0x2   :  { %v1521_v2 = vld [vmem:[%s1996_s1] sm:$0xff]   ;;  %1366 = vmatprep.mubr.msk.bf16.mxu0 %vm1583_vm0, %v1582_v0  ;;  %1394 = vmatprep.mubr.msk.bf16.mxu1 %vm1583_vm0, %v1582_v0  ;;  %v1523_v4 = vld [vmem:[%s1996_s1 + $0x8] sm:$0xff]   ;;  %v1525_v6 = vld [vmem:[%s1996_s1 + $0x10] sm:$0xff]   ;;  %vm42_vm7 = vsmask.f32 4368  ;;  %vm113_vm8 = vcmask 1043457  }
   0x3   :  { %1351 = vmatpush3.bf16.msra.mxu0 %v1520_v1  ;;  %1379 = vmatpush3.bf16.msra.mxu1 %v1521_v2  ;;  %v1526_v7 = vld [vmem:[%s1996_s1 + $0x58] sm:$0xff]   ;;  %v1528_v9 = vld [vmem:[%s1996_s1 + $0x60] sm:$0xff]   ;;  %v1530_v11 = vld [vmem:[%s1996_s1 + $0x68] sm:$0xff]   ;;  %vm65_vm9 = vsmask.f32 7938 }
   0x4   :  { %1352 = vmatprep.subr.bf16.mxu0 %v1582_v0  ;;  %1380 = vmatprep.subr.bf16.mxu1 %v1582_v0  ;;  %v1527_v8 = vld [vmem:[%s1996_s1 + $0x18] sm:$0xff]   ;;  %v1529_v10 = vld [vmem:[%s1996_s1 + $0x20] sm:$0xff]   ;;  %v26_v13 = vld [vmem:[%s1997_s0 + $0x8] sm:$0xff]  ;;  %vm79_vm10 = vsmask.f32 1280 }
   0x5   :  { %v25_v12 = vld [vmem:[%s1997_s0] sm:$0xff]  ;;  %v27_v14 = vld [vmem:[%s1997_s0 + $0x10] sm:$0xff]  ;;  %v28_v15 = vld [vmem:[%s1997_s0 + $0x18] sm:$0xff]  ;;  %v1276_v19 = vpack.c.bf16 %v26_v13, %v26_v13  ;;  %vm89_vm12 = vsmask.f32 5392 }
   0x6   :  { %vm1680_vm6 = vmand %vm31_vm2, %vm32_vm1  ;;  %v34_v17 = vld [vmem:[#allocation2] sm:$0x1]  ;;  %v1275_v18 = vpack.c.bf16 %v25_v12, %v25_v12  ;;  %v1277_v20 = vpack.c.bf16 %v27_v14, %v27_v14  ;;  %v1531_v21 = vld [vmem:[%s1996_s1 + $0x28] sm:$0xff]   ;;  %v1278_v23 = vpack.c.bf16 %v28_v15, %v28_v15 }
   0x7   :  { %1353 = vmatpush3.bf16.msra.mxu0 %v1522_v3  ;;  %1381 = vmatpush3.bf16.msra.mxu1 %v1523_v4  ;;  %v35_v22 = vsel %vm1680_vm6, 0, %v34_v17  ;;  %v53_v26 = vshrl.u32 %v1276_v19, 16  ;;  %v56_v27 = vshll.u32 %v1276_v19, 16  ;;  %v81_v28 = vld [vmem:[#allocation2 + $0x8] sm:$0x2]  ;;  %v1532_v29 = vld [vmem:[%s1996_s1 + $0x70] sm:$0xff]   ;;  %vm1699_vm11 = vmand %vm78_vm4, %vm79_vm10 }
   0x8   :  { %1354 = vmatprep.subr.bf16.mxu0 %v1582_v0  ;;  %1382 = vmatprep.subr.bf16.mxu1 %v1582_v0  ;;  %36 = vst [vmem:[#allocation2] sm:$0x1] %v35_v22  ;;  %v45_v24 = vshrl.u32 %v1275_v18, 16  ;;  %v48_v25 = vshll.u32 %v1275_v18, 16  ;;  %v71_v30 = vld [vmem:[#allocation2 + $0x8] sm:$0x1]  ;;  %vm1705_vm13 = vmor %vm32_vm1, %vm42_vm7 }
   0x9   :  { %v92_v31 = vshrl.u32 %v1277_v20, 16  ;;  %v95_v32 = vshll.u32 %v1277_v20, 16  ;;  %v101_v33 = vshrl.u32 %v1278_v23, 16  ;;  %v1533_v34 = vld [vmem:[%s1996_s1 + $0x30] sm:$0xff]   ;;  %v55_v36 = vrot.slane %v53_v26, 7  ;;  %vm1714_vm14 = vmand %vm64_vm3, %vm65_vm9  ;;  %v1534_v49 = vld [vmem:[%s1996_s1 + $0x78] sm:$0xff]  }
   0xa   :  { %v47_v35 = vrot.slane %v45_v24, 7  ;;  %v104_v38 = vshll.u32 %v1278_v23, 16  ;;  %v82_v40 = vsel %vm1699_vm11, 0, %v81_v28  ;;  %vm1724_vm15 = vmor %vm79_vm10, %vm89_vm12  ;;  %vm114_vm1 = vsmask.f32 7942  ;;  %v1535_v53 = vld [vmem:[%s1996_s1 + $0x38] sm:$0xff]  }
   0xb   :  { %1355 = vmatpush3.bf16.msra.mxu0 %v1524_v5  ;;  %1383 = vmatpush3.bf16.msra.mxu1 %v1525_v6  ;;  %v94_v41 = vrot.slane %v92_v31, 6  ;;  %v97_v42 = vrot.slane %v95_v32, 7  ;;  %v103_v43 = vrot.slane %v101_v33, 6  ;;  %v58_v46 = vor.u32 %v56_v27, %v55_v36  ;;  %83 = vst [vmem:[#allocation2 + $0x8] sm:$0x2] %v82_v40  ;;  %vm1737_vm3 = vmand %vm120_vm5, %vm79_vm10  ;;  %v1539_v26 = vld [vmem:[%s1996_s1 + $0x88] sm:$0xff]  }
   0xc   :  { %1356 = vmatprep.subr.bf16.mxu0 %v1582_v0  ;;  %1384 = vmatprep.subr.bf16.mxu1 %v1582_v0  ;;  %v50_v44 = vor.u32 %v48_v25, %v47_v35  ;;  %v51_v45 = vrot.slane %v47_v35, 4  ;;  %v60_v47 = vrot.slane %v55_v36, 4  ;;  %v106_v52 = vrot.slane %v104_v38, 7  ;;  %v122_v56 = vld [vmem:[#allocation2 + $0x10] sm:$0x3]  ;;  %vm115_vm7 = vmand %vm113_vm8, %vm114_vm1  ;;  %v1542_v33 = vld [vmem:[%s1996_s1 + $0x98] sm:$0xff]  }
   0xd   :  { %v98_v51 = vor.u32 %v97_v42, %v94_v41  ;;  %vm1753_vm5 = vmand %vm31_vm2, %vm65_vm9  ;;  %vm181_vm8 = vsmask.f32 7424  ;;  %v1543_v35 = vld [vmem:[%s1996_s1 + $0xa0] sm:$0xff]   ;;  %v1544_v36 = vld [vmem:[%s1996_s1 + $0xa8] sm:$0xff]  }
   0xe   :  { %v59_v54 = vsel %vm1705_vm13, %v51_v45, %v58_v46  ;;  %v72_v55 = vsel %vm1680_vm6, %v60_v47, %v71_v30  ;;  %v107_v59 = vor.u32 %v106_v52, %v103_v43  ;;  %vm1766_vm2 = vmand %vm78_vm4, %vm114_vm1  ;;  %v1540_v30 = vld [vmem:[%s1996_s1 + $0x90] sm:$0xff]   ;;  %v1547_v42 = vld [vmem:[%s1996_s1 + $0xb8] sm:$0xff]   ;;  %vm443_vm4 = vcmask 1046528  }
   0xf   :  { %1357 = vmatpush3.bf16.msra.mxu0 %v1526_v7  ;;  %1385 = vmatpush3.bf16.msra.mxu1 %v1527_v8  ;;  %v67_v57 = vld [vmem:[#allocation2] sm:$0xf]  ;;  %70 = vst [vmem:[#allocation2 + $0x4] sm:$0xf] %v59_v54  ;;  %73 = vst [vmem:[#allocation2 + $0x8] sm:$0x1] %v72_v55 }
  0x10   :  { %1358 = vmatprep.subr.bf16.mxu0 %v1582_v0  ;;  %1386 = vmatprep.subr.bf16.mxu1 %v1582_v0  ;;  %v99_v58 = vrot.slane %v98_v51, 4  ;;  %v68_v61 = vsel %vm1714_vm14, %v50_v44, %v67_v57  ;;  %v109_v63 = vrot.slane %v107_v59, 4  ;;  %v1546_v40 = vld [vmem:[%s1996_s1 + $0xb0] sm:$0xff]   ;;  %v1550_v50 = vld [vmem:[%s1998_s3 + $0x8] sm:$0xff]   ;;  %v1552_v52 = vld [vmem:[%s1998_s3 + $0x40] sm:$0xff]  }
  0x11   :  { %69 = vst [vmem:[#allocation2] sm:$0xf] %v68_v61  ;;  %v1554_v54 = vld [vmem:[%s1998_s3 + $0x48] sm:$0xff]   ;;  %v1555_v55 = vld [vmem:[%s1998_s3 + $0x20] sm:$0xff]  }
  0x12   :  { %v108_v62 = vsel %vm1724_vm15, %v99_v58, %v107_v59  ;;  %v116_v1 = vld [vmem:[#allocation2 + $0x8] sm:$0xe]  ;;  %v123_v2 = vsel %vm1737_vm3, %v109_v63, %v122_v56  ;;  %v1556_v56 = vld [vmem:[%s1998_s3 + $0x50] sm:$0xff]   ;;  %v1558_v58 = vld [vmem:[%s1998_s3 + $0x58] sm:$0xff]  }
  0x13   :  { %1359 = vmatpush3.bf16.msra.mxu0 %v1528_v9  ;;  %1387 = vmatpush3.bf16.msra.mxu1 %v1529_v10  ;;  %119 = vst [vmem:[#allocation2 + $0xc] sm:$0xf] %v108_v62  ;;  %v117_v4 = vsel %vm115_vm7, %v98_v51, %v116_v1  ;;  %124 = vst [vmem:[#allocation2 + $0x10] sm:$0x3] %v123_v2  ;;  %v1551_v51 = vld [vmem:[%s1998_s3 + $0x10] sm:$0xff]   ;;  %v1557_v57 = vld [vmem:[%s1998_s3 + $0x28] sm:$0xff]  }
  0x14   :  { %1360 = vmatprep.subr.bf16.mxu0 %v1582_v0  ;;  %1388 = vmatprep.subr.bf16.mxu1 %v1582_v0  ;;  %118 = vst [vmem:[#allocation2 + $0x8] sm:$0xe] %v117_v4  ;;  %v1559_v59 = vld [vmem:[%s1998_s3 + $0x30] sm:$0xff]   ;;  %v1560_v61 = vld [vmem:[%s1998_s3 + $0x60] sm:$0xff]   ;;  %v1561_v62 = vld [vmem:[%s1998_s3 + $0x38] sm:$0xff]  }
  0x15   :  { %v1563_v63 = vld [vmem:[%s1998_s3 + $0x68] sm:$0xff]   ;;  %v1564_v1 = vld [vmem:[%s1998_s3 + $0x70] sm:$0xff]   ;;  %v1566_v2 = vld [vmem:[%s1998_s3 + $0x78] sm:$0xff]  }
  0x16   :  { %v75_v5 = vld [vmem:[#allocation2 + $0x8] sm:$0x1]  ;;  %v130_v6 = vld [vmem:[#allocation2 + $0x4] sm:$0xf] }
  0x17   :  { %1361 = vmatpush3.bf16.msra.mxu0 %v1530_v11  ;;  %1389 = vmatpush3.bf16.msra.mxu1 %v1531_v21  ;;  %v76_v7 = vsel %vm1753_vm5, 0, %v75_v5  ;;  %v1538_v21 = vld [vmem:[%s1996_s1 + $0x80] sm:$0xff]   ;;  %v1569_v10 = vld [vmem:[%s1998_s3 + $0x88] sm:$0xff]  }
  0x18   :  { %1362 = vmatprep.subr.bf16.mxu0 %v1582_v0  ;;  %1390 = vmatprep.subr.bf16.mxu1 %v1582_v0  ;;  %77 = vst [vmem:[#allocation2 + $0x8] sm:$0x1] %v76_v7  ;;  %v1761_v8 = vld [vmem:[#allocation2] sm:$0xf] }
  0x19   :  { %v1160_v9 = vcombine.low %v1761_v8, %v130_v6  ;;  %v422_v38 = vld [vmem:[#allocation2] sm:$0xe] }
  0x1a   :  { %v126_v12 = vld [vmem:[#allocation2 + $0x10] sm:$0x2]  ;;  %v1541_v23 = vld [vmem:[#allocation2 + $0x10] ss:$0 sps:$4 sm:$0x33]   ;;  %v1196_v41 = vcombine.low %v422_v38, %v130_v6 }
  0x1b   :  { %1363 = vmatpush3.bf16.msra.mxu0 %v1532_v29  ;;  %1391 = vmatpush3.bf16.msra.mxu1 %v1533_v34  ;;  %v185_v11 = vshll.u32 %v1160_v9, 16  ;;  %v127_v13 = vsel %vm1766_vm2, 0, %v126_v12  ;;  %v183_v14 = vshrl.u32 %v1160_v9, 16  ;;  %v198_v25 = vshll.u32 %v1541_v23, 16  ;;  %v1205_v38 = vld [vmem:[%s1999_s2] ss:$0 sm:$0xff] }
  0x1c   :  { %1364 = vmatprep.subr.bf16.mxu0 %v1582_v0  ;;  %1392 = vmatprep.subr.bf16.mxu1 %v1582_v0  ;;  %128 = vst [vmem:[#allocation2 + $0x10] sm:$0x2] %v127_v13  ;;  %v1545_v28 = vld [vmem:[#allocation2 + $0x10] ss:$0 sps:$4 sm:$0x11]   ;;  %v202_v32 = vshrl.u32 %v1541_v23, 16 }
  0x1d   :  { %v187_v15 = vrot.slane %v185_v11, 1  ;;  %v200_v29 = vrot.slane %v198_v25, 1  ;;  %v444_v43 = vrot.slane %v1196_v41, 1  ;;  %v447_v46 = vrot.slane %v1541_v23, 1 }
  0x1f   :  { %1365 = vmatpush3.bf16.msra.mxu0 %v1534_v49  ;;  %1393 = vmatpush3.bf16.msra.mxu1 %v1535_v53  ;;  %v1537_v17 = vld [vmem:[#allocation2 + $0x8] sm:$0xff]   ;;  %v188_v18 = vor.u32 %v187_v15, %v183_v14  ;;  %v204_v34 = vor.u32 %v202_v32, %v200_v29  ;;  %v1549_v49 = vld [vmem:[%s1998_s3] sm:$0xff]   ;;  %v1553_v53 = vld [vmem:[%s1998_s3 + $0x18] sm:$0xff]  }
  0x20   :  { %1406 = vmatprep.subr.bf16.mxu0 %v1582_v0  ;;  %1434 = vmatprep.subr.bf16.mxu1 %v1582_v0  ;;  %v190_v19 = vshll.u32 %v1537_v17, 16  ;;  %v194_v22 = vshrl.u32 %v1537_v17, 16  ;;  %v445_v44 = vrot.slane %v1537_v17, 1 }
  0x22   :  { %1395 = vmatmul.mubr.bf16.vlgmr.msra.gmra.mrb[0].mxu1 %v1160_v9  ;;  %v192_v20 = vrot.slane %v190_v19, 1  ;;  %v446_v45 = vsel %vm443_vm4, %v444_v43, %v445_v44  ;;  %v448_v47 = vsel %vm443_vm4, %v445_v44, %v447_v46 }
  0x23   :  { %1398 = vmatprep.mubr.msk.bf16.mxu1 %vm1583_vm0, %v1582_v0  ;;  %1435 = vmatpush3.bf16.msra.mxu1 %v1552_v52 }
  0x24   :  { %v193_v24 = vsel %vm181_vm8, %v188_v18, %v192_v20  ;;  %v196_v27 = vor.u32 %v194_v22, %v192_v20  ;;  %1436 = vmatprep.subr.bf16.mxu1 %v1582_v0 }
  0x25   :  { %1367 = vmatmul.mubr.bf16.vlgmr.msra.gmra.mrb[0].mxu0 %v193_v24 }
  0x26   :  { %1407 = vmatpush3.bf16.msra.mxu0 %v1538_v21  ;;  %1370 = vmatprep.mubr.msk.bf16.mxu0 %vm1583_vm0, %v1582_v0  ;;  %v201_v31 = vsel %vm181_vm8, %v196_v27, %v200_v29 }
  0x27   :  { %1408 = vmatprep.subr.bf16.mxu0 %v1582_v0  ;;  %1437 = vmatpush3.bf16.msra.mxu1 %v1554_v54 }
  0x28   :  { %1438 = vmatprep.subr.bf16.mxu1 %v1582_v0 }
  0x2a   :  { %1399 = vmatmul.mubr.bf16.gmra.mrb[4].mxu1 %v1537_v17  ;;  %1409 = vmatpush3.bf16.msra.mxu0 %v1539_v26 }
  0x2b   :  { %1402 = vmatprep.mubr.msk.bf16.mxu1 %vm1583_vm0, %v1582_v0  ;;  %1410 = vmatprep.subr.bf16.mxu0 %v1582_v0 }
  0x2c   :  { %1439 = vmatpush3.bf16.msra.mxu1 %v1556_v56 }
  0x2d   :  { %1371 = vmatmul.mubr.bf16.gmra.mrb[4].mxu0 %v201_v31  ;;  %1440 = vmatprep.subr.bf16.mxu1 %v1582_v0 }
  0x2e   :  { %1411 = vmatpush3.bf16.msra.mxu0 %v1540_v30  ;;  %1374 = vmatprep.mubr.msk.bf16.mxu0 %vm1583_vm0, %v1582_v0 }
  0x2f   :  { %1412 = vmatprep.subr.bf16.mxu0 %v1582_v0 }
  0x30   :  { %1441 = vmatpush3.bf16.msra.mxu1 %v1558_v58 }
  0x31   :  { %1442 = vmatprep.subr.bf16.mxu1 %v1582_v0 }
  0x32   :  { %1403 = vmatmul.mubr.bf16.gmra.mrb[8].mxu1 %v1545_v28  ;;  %1413 = vmatpush3.bf16.msra.mxu0 %v1542_v33 }
  0x33   :  { %1450 = vmatprep.mubr.msk.bf16.mxu1 %vm1583_vm0, %v1582_v0  ;;  %1414 = vmatprep.subr.bf16.mxu0 %v1582_v0 }
  0x34   :  { %1443 = vmatpush3.bf16.msra.mxu1 %v1560_v61 }
  0x35   :  { %1375 = vmatmul.mubr.bf16.gmra.mrb[8].mxu0 %v204_v34  ;;  %1444 = vmatprep.subr.bf16.mxu1 %v1582_v0 }
  0x36   :  { %1415 = vmatpush3.bf16.msra.mxu0 %v1543_v35  ;;  %1422 = vmatprep.mubr.msk.bf16.mxu0 %vm1583_vm0, %v1582_v0 }
  0x37   :  { %1416 = vmatprep.subr.bf16.mxu0 %v1582_v0 }
  0x38   :  { %1445 = vmatpush3.bf16.msra.mxu1 %v1563_v63 }
  0x39   :  { %1446 = vmatprep.subr.bf16.mxu1 %v1582_v0 }
  0x3a   :  { %1417 = vmatpush3.bf16.msra.mxu0 %v1544_v36 }
  0x3b   :  { %1418 = vmatprep.subr.bf16.mxu0 %v1582_v0 }
  0x3c   :  { %1447 = vmatpush3.bf16.msra.mxu1 %v1564_v1 }
  0x3d   :  { %1448 = vmatprep.subr.bf16.mxu1 %v1582_v0 }
  0x3e   :  { %1419 = vmatpush3.bf16.msra.mxu0 %v1546_v40 }
  0x3f   :  { %1420 = vmatprep.subr.bf16.mxu0 %v1582_v0 }
  0x40   :  { %1449 = vmatpush3.bf16.msra.mxu1 %v1566_v2 }
  0x41   :  { %1490 = vmatprep.subr.bf16.mxu1 %v1582_v0 }
  0x42   :  { %1421 = vmatpush3.bf16.msra.mxu0 %v1547_v42  ;;  %v579_v42 = vstv %s2000_s5 }
  0x43   :  { %1462 = vmatprep.subr.bf16.mxu0 %v1582_v0 }
  0x45   :  { %1423 = vmatmul.mubr.bf16.vlgmr.msra.gmra.mrb[12].mxu0 %v446_v45 }
  0x46   :  { %1426 = vmatprep.mubr.msk.bf16.mxu0 %vm1583_vm0, %v1582_v0  ;;  %1463 = vmatpush3.bf16.msra.mxu0 %v1549_v49 }
  0x47   :  { %1464 = vmatprep.subr.bf16.mxu0 %v1582_v0 }
  0x4a   :  { %1465 = vmatpush3.bf16.msra.mxu0 %v1550_v50 }
  0x4b   :  { %1466 = vmatprep.subr.bf16.mxu0 %v1582_v0 }
  0x4d   :  { %1427 = vmatmul.mubr.bf16.gmra.mrb[16].mxu0 %v448_v47 }
  0x4e   :  { %1430 = vmatprep.mubr.msk.bf16.mxu0 %vm1583_vm0, %v1582_v0  ;;  %1467 = vmatpush3.bf16.msra.mxu0 %v1551_v51 }
  0x4f   :  { %1468 = vmatprep.subr.bf16.mxu0 %v1582_v0 }
  0x52   :  { %1469 = vmatpush3.bf16.msra.mxu0 %v1553_v53 }
  0x53   :  { %1470 = vmatprep.subr.bf16.mxu0 %v1582_v0 }
  0x55   :  { %1431 = vmatmul.mubr.bf16.gmra.mrb[20].mxu0 %v447_v46 }
  0x56   :  { %1478 = vmatprep.mubr.msk.bf16.mxu0 %vm1583_vm0, %v1582_v0  ;;  %1471 = vmatpush3.bf16.msra.mxu0 %v1555_v55 }
  0x57   :  { %1472 = vmatprep.subr.bf16.mxu0 %v1582_v0 }
  0x5a   :  { %1473 = vmatpush3.bf16.msra.mxu0 %v1557_v57 }
  0x5b   :  { %1474 = vmatprep.subr.bf16.mxu0 %v1582_v0 }
  0x5e   :  { %1475 = vmatpush3.bf16.msra.mxu0 %v1559_v59 }
  0x5f   :  { %1476 = vmatprep.subr.bf16.mxu0 %v1582_v0 }
  0x62   :  { %1477 = vmatpush3.bf16.msra.mxu0 %v1561_v62 }
  0xf5   :  { %v400_v4 = vpop.f32.mrb[0].mxu1 }
  0xf6   :  { %v1396_v5 = vpop.f32.mrb[1].mxu1 }
  0xf7   :  { %v403_v6 = vpop.f32.mrb[2].mxu1 }
  0xf8   :  { %v1397_v7 = vpop.f32.mrb[3].mxu1  ;;  %v290_v13 = vpop.f32.mrb[0].mxu0 }
  0xf9   :  { %v401_v15 = vadd.f32 %v400_v4, %v290_v13  ;;  %v1368_v17 = vpop.f32.mrb[1].mxu0 }
  0xfa   :  { %v293_v18 = vpop.f32.mrb[2].mxu0 }
  0xfb   :  { %v404_v19 = vadd.f32 %v403_v6, %v293_v18  ;;  %v1369_v20 = vpop.f32.mrb[3].mxu0 }
  0xfd   :  { %v408_v9 = vpop.f32.mrb[4].mxu1 }
  0xfe   :  { %v1400_v11 = vpop.f32.mrb[5].mxu1 }
  0xff   :  { %v411_v12 = vpop.f32.mrb[6].mxu1 }
 0x100   :  { %v1401_v14 = vpop.f32.mrb[7].mxu1  ;;  %v298_v24 = vpop.f32.mrb[4].mxu0 }
 0x101   :  { %v1372_v26 = vpop.f32.mrb[5].mxu0  ;;  %v409_v27 = vadd.f32 %v408_v9, %v298_v24 }
 0x102   :  { %v301_v28 = vpop.f32.mrb[6].mxu0 }
 0x103   :  { %v1373_v29 = vpop.f32.mrb[7].mxu0  ;;  %v412_v30 = vadd.f32 %v411_v12, %v301_v28 }
 0x105   :  { %v416_v21 = vpop.f32.mrb[8].mxu1 }
 0x106   :  { %v1404_v22 = vpop.f32.mrb[9].mxu1 }
 0x107   :  { %v419_v23 = vpop.f32.mrb[10].mxu1 }
 0x108   :  { %v1405_v25 = vpop.f32.mrb[11].mxu1  ;;  %v306_v31 = vpop.f32.mrb[8].mxu0 }
 0x109   :  { %v1376_v32 = vpop.f32.mrb[9].mxu0  ;;  %v417_v33 = vadd.f32 %v416_v21, %v306_v31 }
 0x10a   :  { %v309_v34 = vpop.f32.mrb[10].mxu0 }
 0x10b   :  { %v1377_v35 = vpop.f32.mrb[11].mxu0 }
 0x118   :  { %v534_v36 = vpop.f32.mrb[12].mxu0 }
 0x119   :  { %v556_v40 = vadd.f32 %v534_v36, %v401_v15  ;;  %v1424_v41 = vpop.f32.mrb[13].mxu0 }
 0x11a   :  { %v537_v43 = vpop.f32.mrb[14].mxu0 }
 0x11b   :  { %v568_v44 = vadd.f32 %v1205_v38, %v556_v40  ;;  %v557_v45 = vadd.f32 %v537_v43, %v404_v19  ;;  %v1425_v46 = vpop.f32.mrb[15].mxu0 }
 0x11d   :  { %vm574_vm9 = vcmp.gt.f32.partialorder %v568_v44, 0.0  ;;  %v580_v47 = vmul.f32 %v579_v42, %v568_v44  ;;  %v569_v49 = vadd.f32 %v1205_v38, %v557_v45 }
 0x11f   :  { %v585_v50 = vsel %vm574_vm9, %v568_v44, %v580_v47  ;;  %vm575_vm10 = vcmp.gt.f32.partialorder %v569_v49, 0.0  ;;  %v581_v51 = vmul.f32 %v579_v42, %v569_v49 }
 0x120   :  { %v1279_v52 = vpack.c.bf16 %v585_v50, %v585_v50  ;;  %v542_v53 = vpop.f32.mrb[16].mxu0 }
 0x121   :  { %v586_v54 = vsel %vm575_vm10, %v569_v49, %v581_v51  ;;  %v558_v55 = vadd.f32 %v542_v53, %v409_v27  ;;  %v1428_v56 = vpop.f32.mrb[17].mxu0  ;;  %v659_v51 = vld [vmem:[#allocation2 + $0x10] sm:$0x3] }
 0x122   :  { %v607_v57 = vshrl.u32 %v1279_v52, 16  ;;  %v1280_v58 = vpack.c.bf16 %v586_v54, %v586_v54  ;;  %v545_v59 = vpop.f32.mrb[18].mxu0  ;;  %v610_v2 = vshll.u32 %v1279_v52, 16 }
 0x123   :  { %v570_v61 = vadd.f32 %v1205_v38, %v558_v55  ;;  %v559_v62 = vadd.f32 %v545_v59, %v412_v30  ;;  %v1429_v63 = vpop.f32.mrb[19].mxu0 }
 0x124   :  { %v609_v1 = vrot.slane %v607_v57, 7  ;;  %v615_v4 = vshrl.u32 %v1280_v58, 16  ;;  %v618_v11 = vshll.u32 %v1280_v58, 16 }
 0x125   :  { %vm576_vm12 = vcmp.gt.f32.partialorder %v570_v61, 0.0  ;;  %v582_v5 = vmul.f32 %v579_v42, %v570_v61  ;;  %v571_v6 = vadd.f32 %v1205_v38, %v559_v62 }
 0x126   :  { %v612_v7 = vor.u32 %v610_v2, %v609_v1  ;;  %v617_v9 = vrot.slane %v615_v4, 7  ;;  %v613_v14 = vrot.slane %v609_v1, 4  ;;  %v1567_v4 = vld [vmem:[%s1998_s3 + $0x80] sm:$0xff]  }
 0x127   :  { %v587_v12 = vsel %vm576_vm12, %v570_v61, %v582_v5  ;;  %vm577_vm15 = vcmp.gt.f32.partialorder %v571_v6, 0.0  ;;  %v583_v13 = vmul.f32 %v579_v42, %v571_v6 }
 0x128   :  { %v654_v15 = vsel %vm1714_vm14, %v612_v7, %v1761_v8  ;;  %v620_v17 = vor.u32 %v618_v11, %v617_v9  ;;  %v1281_v18 = vpack.c.bf16 %v587_v12, %v587_v12  ;;  %v550_v19 = vpop.f32.mrb[20].mxu0  ;;  %v622_v31 = vrot.slane %v617_v9, 4  ;;  %v1570_v12 = vld [vmem:[%s1998_s3 + $0x90] sm:$0xff]  }
 0x129   :  { %655 = vst [vmem:[#allocation2] sm:$0xf] %v654_v15  ;;  %v588_v20 = vsel %vm577_vm15, %v571_v6, %v583_v13  ;;  %v560_v21 = vadd.f32 %v550_v19, %v417_v33  ;;  %v1432_v22 = vpop.f32.mrb[21].mxu0 }
 0x12a   :  { %v621_v23 = vsel %vm1705_vm13, %v613_v14, %v620_v17  ;;  %v624_v24 = vshrl.u32 %v1281_v18, 16  ;;  %v1282_v25 = vpack.c.bf16 %v588_v20, %v588_v20  ;;  %v553_v26 = vpop.f32.mrb[22].mxu0  ;;  %v627_v30 = vshll.u32 %v1281_v18, 16  ;;  %v1572_v17 = vld [vmem:[%s1998_s3 + $0x98] sm:$0xff]   ;;  %v1573_v18 = vld [vmem:[%s1998_s3 + $0xa0] sm:$0xff]   ;;  %v1575_v22 = vld [vmem:[%s1998_s3 + $0xb0] sm:$0xff]  }
 0x12b   :  { %656 = vst [vmem:[#allocation2 + $0x4] sm:$0xf] %v621_v23  ;;  %v572_v27 = vadd.f32 %v1205_v38, %v560_v21  ;;  %v1433_v28 = vpop.f32.mrb[23].mxu0  ;;  %v1574_v21 = vld [vmem:[%s1998_s3 + $0xa8] sm:$0xff]  }
 0x12c   :  { %v626_v29 = vrot.slane %v624_v24, 7  ;;  %v633_v48 = vshrl.u32 %v1282_v25, 16  ;;  %v636_v35 = vshll.u32 %v1282_v25, 16  ;;  %v1576_v24 = vld [vmem:[%s1998_s3 + $0xb8] sm:$0xff]  }
 0x12d   :  { %vm578_vm14 = vcmp.gt.f32.partialorder %v572_v27, 0.0  ;;  %v584_v8 = vmul.f32 %v579_v42, %v572_v27 }
 0x12e   :  { %v629_v32 = vor.u32 %v627_v30, %v626_v29  ;;  %v635_v34 = vrot.slane %v633_v48, 7  ;;  %v631_v41 = vrot.slane %v626_v29, 4 }
 0x12f   :  { %v589_v33 = vsel %vm578_vm14, %v572_v27, %v584_v8 }
 0x130   :  { %v662_v36 = vld [vmem:[#allocation2] sm:$0x1]  ;;  %v630_v40 = vsel %vm1705_vm13, %v622_v31, %v629_v32  ;;  %v638_v43 = vor.u32 %v636_v35, %v635_v34  ;;  %v1283_v44 = vpack.c.bf16 %v589_v33, %v589_v33  ;;  %v640_v49 = vrot.slane %v635_v34, 4  ;;  %v966_v23 = vld [vmem:[#allocation2] sm:$0xe] }
 0x131   :  { %v663_v38 = vsel %vm1680_vm6, 0, %v662_v36  ;;  %657 = vst [vmem:[#allocation2 + $0x8] sm:$0xf] %v630_v40 }
 0x132   :  { %664 = vst [vmem:[#allocation2] sm:$0x1] %v663_v38  ;;  %v639_v42 = vsel %vm1705_vm13, %v631_v41, %v638_v43  ;;  %v642_v45 = vshrl.u32 %v1283_v44, 16  ;;  %v645_v47 = vshll.u32 %v1283_v44, 16  ;;  %v1910_v56 = vld [vmem:[#allocation2 + $0x4] sm:$0xf] }
 0x133   :  { %658 = vst [vmem:[#allocation2 + $0xc] sm:$0xf] %v639_v42  ;;  %v1263_v25 = vcombine.low %v966_v23, %v1910_v56  ;;  %v1580_v23 = vld [vmem:[%s1997_s0 + $0x10] sm:$0xff] }
 0x134   :  { %v644_v46 = vrot.slane %v642_v45, 7 }
 0x135   :  { %v987_v27 = vrot.slane %v1263_v25, 1 }
 0x136   :  { %v647_v50 = vor.u32 %v645_v47, %v644_v46 }
 0x138   :  { %v648_v52 = vsel %vm1705_vm13, %v640_v49, %v647_v50  ;;  %v665_v53 = vld [vmem:[#allocation2 + $0x8] sm:$0x1]  ;;  %v668_v54 = vld [vmem:[#allocation2 + $0x8] sm:$0x2] }
 0x139   :  { %v660_v16 = vsel %vm1737_vm3, %v648_v52, %v659_v51  ;;  %v674_v55 = vld [vmem:[#allocation2] sm:$0xf]  ;;  %v666_v57 = vsel %vm1753_vm5, 0, %v665_v53  ;;  %v669_v58 = vsel %vm1699_vm11, 0, %v668_v54 }
 0x13a   :  { %661 = vst [vmem:[#allocation2 + $0x10] sm:$0x3] %v660_v16  ;;  %v1227_v59 = vcombine.low %v674_v55, %v1910_v56  ;;  %667 = vst [vmem:[#allocation2 + $0x8] sm:$0x1] %v666_v57 }
 0x13b   :  { %670 = vst [vmem:[#allocation2 + $0x8] sm:$0x2] %v669_v58 }
 0x13c   :  { %1479 = vmatmul.mubr.bf16.vlgmr.msra.gmra.mrb[24].mxu0 %v1227_v59  ;;  %v729_v39 = vshll.u32 %v1227_v59, 16  ;;  %v727_v63 = vshrl.u32 %v1227_v59, 16 }
 0x13d   :  { %1482 = vmatprep.mubr.msk.bf16.mxu0 %vm1583_vm0, %v1582_v0 }
 0x13e   :  { %v731_v62 = vrot.slane %v729_v39, 1  ;;  %v1272_v39 = vld [vmem:[%s2001_s4] ss:$0 sm:$0xff] }
 0x140   :  { %v732_v1 = vor.u32 %v731_v62, %v727_v63 }
 0x141   :  { %v671_v60 = vld [vmem:[#allocation2 + $0x10] sm:$0x2]  ;;  %v1568_v6 = vld [vmem:[#allocation2 + $0x10] ss:$0 sps:$4 sm:$0x11]  }
 0x142   :  { %v1565_v61 = vld [vmem:[#allocation2 + $0x8] sm:$0xff]   ;;  %v672_v3 = vsel %vm1766_vm2, 0, %v671_v60  ;;  %v1571_v7 = vld [vmem:[#allocation2 + $0x10] ss:$0 sps:$4 sm:$0x33]  }
 0x143   :  { %673 = vst [vmem:[#allocation2 + $0x10] sm:$0x2] %v672_v3  ;;  %v734_v37 = vshll.u32 %v1565_v61, 16  ;;  %v738_v9 = vshrl.u32 %v1565_v61, 16  ;;  %v742_v11 = vshll.u32 %v1571_v7, 16  ;;  %v746_v19 = vshrl.u32 %v1571_v7, 16 }
 0x144   :  { %1483 = vmatmul.mubr.bf16.gmra.mrb[28].mxu0 %v1565_v61  ;;  %v988_v26 = vrot.slane %v1565_v61, 1  ;;  %v990_v29 = vrot.slane %v1571_v7, 1 }
 0x145   :  { %v736_v2 = vrot.slane %v734_v37, 1  ;;  %1486 = vmatprep.mubr.msk.bf16.mxu0 %vm1583_vm0, %v1582_v0  ;;  %v744_v14 = vrot.slane %v742_v11, 1 }
 0x146   :  { %v989_v28 = vsel %vm443_vm4, %v987_v27, %v988_v26  ;;  %v991_v30 = vsel %vm443_vm4, %v988_v26, %v990_v29 }
 0x147   :  { %v737_v5 = vsel %vm181_vm8, %v732_v1, %v736_v2  ;;  %v740_v13 = vor.u32 %v738_v9, %v736_v2  ;;  %v748_v20 = vor.u32 %v746_v19, %v744_v14  ;;  %v1578_v1 = vld [vmem:[%s1997_s0] sm:$0xff] }
 0x148   :  { %1451 = vmatmul.mubr.bf16.vlgmr.msra.gmra.mrb[12].mxu1 %v737_v5  ;;  %v1579_v5 = vld [vmem:[%s1997_s0 + $0x8] sm:$0xff] }
 0x149   :  { %1491 = vmatpush3.bf16.msra.mxu1 %v1567_v4  ;;  %1454 = vmatprep.mubr.msk.bf16.mxu1 %vm1583_vm0, %v1582_v0  ;;  %v745_v15 = vsel %vm181_vm8, %v740_v13, %v744_v14 }
 0x14a   :  { %1492 = vmatprep.subr.bf16.mxu1 %v1582_v0 }
 0x14c   :  { %1487 = vmatmul.mubr.bf16.gmra.mrb[32].mxu0 %v1568_v6 }
 0x14d   :  { %1493 = vmatpush3.bf16.msra.mxu1 %v1569_v10 }
 0x14e   :  { %1494 = vmatprep.subr.bf16.mxu1 %v1582_v0 }
 0x150   :  { %1455 = vmatmul.mubr.bf16.gmra.mrb[16].mxu1 %v745_v15 }
 0x151   :  { %1495 = vmatpush3.bf16.msra.mxu1 %v1570_v12  ;;  %1458 = vmatprep.mubr.msk.bf16.mxu1 %vm1583_vm0, %v1582_v0 }
 0x152   :  { %1496 = vmatprep.subr.bf16.mxu1 %v1582_v0 }
 0x155   :  { %1497 = vmatpush3.bf16.msra.mxu1 %v1572_v17 }
 0x156   :  { %1498 = vmatprep.subr.bf16.mxu1 %v1582_v0 }
 0x158   :  { %1459 = vmatmul.mubr.bf16.gmra.mrb[20].mxu1 %v748_v20 }
 0x159   :  { %1499 = vmatpush3.bf16.msra.mxu1 %v1573_v18  ;;  %1506 = vmatprep.mubr.msk.bf16.mxu1 %vm1583_vm0, %v1582_v0 }
 0x15a   :  { %1500 = vmatprep.subr.bf16.mxu1 %v1582_v0 }
 0x15d   :  { %1501 = vmatpush3.bf16.msra.mxu1 %v1574_v21 }
 0x15e   :  { %1502 = vmatprep.subr.bf16.mxu1 %v1582_v0 }
 0x161   :  { %1503 = vmatpush3.bf16.msra.mxu1 %v1575_v22 }
 0x162   :  { %1504 = vmatprep.subr.bf16.mxu1 %v1582_v0 }
 0x165   :  { %1505 = vmatpush3.bf16.msra.mxu1 %v1576_v24 }
 0x168   :  { %1507 = vmatmul.mubr.bf16.vlgmr.msra.gmra.mrb[24].mxu1 %v989_v28 }
 0x169   :  { %1510 = vmatprep.mubr.msk.bf16.mxu1 %vm1583_vm0, %v1582_v0 }
 0x170   :  { %1511 = vmatmul.mubr.bf16.gmra.mrb[28].mxu1 %v991_v30  ;;  %v1581_v30 = vld [vmem:[%s1997_s0 + $0x18] sm:$0xff] }
 0x171   :  { %1514 = vmatprep.mubr.msk.bf16.mxu1 %vm1583_vm0, %v1582_v0  ;;  %vm1123_vm0 = vcmask 1045504  }
 0x178   :  { %1515 = vmatmul.mubr.bf16.gmra.mrb[32].mxu1 %v990_v29 }
 0x20f   :  { %v944_v48 = vpop.f32.mrb[24].mxu0 }
 0x210   :  { %v1480_v8 = vpop.f32.mrb[25].mxu0 }
 0x211   :  { %v947_v31 = vpop.f32.mrb[26].mxu0 }
 0x212   :  { %v1481_v32 = vpop.f32.mrb[27].mxu0 }
 0x217   :  { %v952_v34 = vpop.f32.mrb[28].mxu0 }
 0x218   :  { %v1484_v35 = vpop.f32.mrb[29].mxu0 }
 0x219   :  { %v955_v33 = vpop.f32.mrb[30].mxu0 }
 0x21a   :  { %v1485_v36 = vpop.f32.mrb[31].mxu0 }
 0x21b   :  { %v834_v40 = vpop.f32.mrb[12].mxu1 }
 0x21c   :  { %v945_v41 = vadd.f32 %v944_v48, %v834_v40  ;;  %v1452_v43 = vpop.f32.mrb[13].mxu1 }
 0x21d   :  { %v837_v44 = vpop.f32.mrb[14].mxu1 }
 0x21e   :  { %v948_v38 = vadd.f32 %v947_v31, %v837_v44  ;;  %v1453_v42 = vpop.f32.mrb[15].mxu1 }
 0x21f   :  { %v960_v45 = vpop.f32.mrb[32].mxu0 }
 0x220   :  { %v1488_v46 = vpop.f32.mrb[33].mxu0 }
 0x221   :  { %v963_v47 = vpop.f32.mrb[34].mxu0 }
 0x222   :  { %v1489_v49 = vpop.f32.mrb[35].mxu0 }
 0x223   :  { %v842_v0 = vpop.f32.mrb[16].mxu1 }
 0x224   :  { %v953_v50 = vadd.f32 %v952_v34, %v842_v0  ;;  %v1456_v51 = vpop.f32.mrb[17].mxu1 }
 0x225   :  { %v845_v52 = vpop.f32.mrb[18].mxu1 }
 0x226   :  { %v956_v53 = vadd.f32 %v955_v33, %v845_v52  ;;  %v1457_v54 = vpop.f32.mrb[19].mxu1 }
 0x22b   :  { %v850_v16 = vpop.f32.mrb[20].mxu1 }
 0x22c   :  { %v961_v55 = vadd.f32 %v960_v45, %v850_v16  ;;  %v1460_v56 = vpop.f32.mrb[21].mxu1 }
 0x22d   :  { %v853_v57 = vpop.f32.mrb[22].mxu1 }
 0x22e   :  { %v1461_v58 = vpop.f32.mrb[23].mxu1 }
 0x23b   :  { %v1077_v59 = vpop.f32.mrb[24].mxu1 }
 0x23c   :  { %v1099_v60 = vadd.f32 %v1077_v59, %v945_v41  ;;  %v1508_v61 = vpop.f32.mrb[25].mxu1 }
 0x23d   :  { %v1080_v62 = vpop.f32.mrb[26].mxu1 }
 0x23e   :  { %v1111_v3 = vadd.f32 %v1272_v39, %v1099_v60  ;;  %v1100_v63 = vadd.f32 %v1080_v62, %v948_v38  ;;  %v1509_v37 = vpop.f32.mrb[27].mxu1 }
 0x240   :  { %v1116_v2 = vadd.f32 %v1578_v1, %v1111_v3  ;;  %v1112_v4 = vadd.f32 %v1272_v39, %v1100_v63 }
 0x242   :  { %1118 = vst [vmem:[%s2002_s6] sm:$0xff] %v1116_v2  ;;  %v1117_v6 = vadd.f32 %v1579_v5, %v1112_v4 }
 0x243   :  { %v1085_v10 = vpop.f32.mrb[28].mxu1 }
 0x244   :  { %1119 = vst [vmem:[%s2002_s6 + $0x8] sm:$0xff] %v1117_v6  ;;  %v1101_v7 = vadd.f32 %v1085_v10, %v953_v50  ;;  %v1512_v9 = vpop.f32.mrb[29].mxu1 }
 0x245   :  { %v1088_v11 = vpop.f32.mrb[30].mxu1 }
 0x246   :  { %v1113_v12 = vadd.f32 %v1272_v39, %v1101_v7  ;;  %v1102_v13 = vadd.f32 %v1088_v11, %v956_v53  ;;  %v1513_v14 = vpop.f32.mrb[31].mxu1 }
 0x248   :  { %v1114_v15 = vadd.f32 %v1272_v39, %v1102_v13  ;;  %v1124_v17 = vrot.slane %v1113_v12, 2 }
 0x24a   :  { %v1125_v18 = vrot.slane %v1114_v15, 2 }
 0x24b   :  { %v1093_v19 = vpop.f32.mrb[32].mxu1 }
 0x24c   :  { %v1126_v20 = vsel %vm1123_vm0, %v1124_v17, %v1125_v18  ;;  %v1103_v21 = vadd.f32 %v1093_v19, %v961_v55  ;;  %v1516_v22 = vpop.f32.mrb[33].mxu1 }
 0x24d   :  { %v1131_v24 = vadd.f32 %v1580_v23, %v1126_v20  ;;  %v1096_v25 = vpop.f32.mrb[34].mxu1 }
 0x24e   :  { %v1115_v26 = vadd.f32 %v1272_v39, %v1103_v21  ;;  %v1517_v27 = vpop.f32.mrb[35].mxu1 }
 0x24f   :  { %1273 = vst [vmem:[%s2002_s6 + $0x10] sm:$0xff] %v1131_v24 }
 0x250   :  { %v1127_v28 = vrot.slane %v1115_v26, 2 }
 0x252   :  { %v1128_v29 = vsel %vm1123_vm0, %v1125_v18, %v1127_v28 }
 0x253   :  { %v1132_v48 = vadd.f32 %v1581_v30, %v1128_v29 }
 0x255   :  { %1274 = vst [vmem:[%s2002_s6 + $0x18] sm:$0xff] %v1132_v48 }

</bundles_post_ra>
